<compile_context>
chip_gen: v7x
topology: tpu7x:2x2x1
jax: 0.10.0
libtpu: 0.0.40
codegen_flags: <defaults>
</compile_context>

<pallas_src>
import functools

import jax
import jax.numpy as jnp
from jax import lax
from jax.experimental import pallas as pl
from jax.experimental.pallas import tpu as pltpu

_LANE = 128


def _maml_linear_kernel(x_ref, w_ref, b_ref, o_ref, wpad_ref, bpad_ref, *,
                        way_num, mxu_dtype):
    # x_ref:    (1, rb, D)        VMEM   input rows for this (task, row-block)
    # w_ref:    (1, way, D)       VMEM   weight in PyTorch Linear layout
    # b_ref:    (1, 1, way)       VMEM   bias
    # o_ref:    (1, rb, way_pad)  VMEM   lane-dense (way padded to 128) output
    # wpad_ref: (way_pad, D)      VMEM scratch
    # bpad_ref: (1, way_pad)      VMEM scratch (f32)
    way_pad, feat_dim = wpad_ref.shape

    # Stage W and b into lane-dense scratch: zero-fill, then overwrite the
    # first `way_num` rows/lanes with the real parameters. A few vreg stores,
    # all on-chip -- no wrapper-side pad/transpose, no extra HBM traffic.
    wpad_ref[...] = jnp.zeros((way_pad, feat_dim), dtype=wpad_ref.dtype)
    wpad_ref[:way_num, :] = w_ref[0].astype(wpad_ref.dtype)
    bpad_ref[...] = jnp.zeros((1, way_pad), dtype=bpad_ref.dtype)
    bpad_ref[:, :way_num] = b_ref[0].astype(bpad_ref.dtype)

    x = x_ref[0]
    if mxu_dtype is not None:          # bf16 MXU feed (v6e/v7x); accum stays f32
        x = x.astype(mxu_dtype)

    # y = x @ W.T : contract the feature dims directly (rhs-transposed matmul
    # on the MXU). Result is (rb, way_pad) -- a lane-dense, 128-wide tile.
    acc = lax.dot_general(
        x, wpad_ref[...],
        dimension_numbers=(((1,), (1,)), ((), ())),
        preferred_element_type=jnp.float32,
    )
    # f32 epilogue: bias add + output cast (VPU-friendly on all gens incl. v5e).
    o_ref[0] = (acc + bpad_ref[...]).astype(o_ref.dtype)


def maml_layer_forward(x, weight, bias, *, row_block=512, mxu_dtype=None):
    """Forward of MAMLLayer: y = x @ weight.T + bias.

    x:      (N, feat_dim)            single forward, or
            (T, N, feat_dim)         T MAML tasks batched into one launch.
    weight: (way_num, feat_dim) or (T, way_num, feat_dim)  (per-task fast weights)
    bias:   (way_num,)          or (T, way_num)
    Returns (N, way_num) or (T, N, way_num) in x.dtype.
    """
    squeeze_task = (x.ndim == 2)
    if squeeze_task:
        x = x[None]
    if weight.ndim == 2:
        weight = weight[None]
    if bias.ndim == 1:
        bias = bias[None]

    num_tasks, n, feat_dim = x.shape
    way_num = weight.shape[-2]
    assert weight.shape[-1] == feat_dim
    assert weight.shape[0] in (1, num_tasks)
    assert bias.shape[0] in (1, num_tasks) and bias.shape[-1] == way_num

    way_pad = _LANE * pl.cdiv(way_num, _LANE)        # lane-dense class dim
    bias3 = bias.reshape(bias.shape[0], 1, way_num)  # unit-dim reshape: free

    # Row tiling: full feat_dim (=K) in one block (never tile K); tile N only
    # if it grows beyond `row_block` (256-512 reaches ~85% of HBM roofline).
    rb = n if n <= row_block else row_block
    num_row_blocks = pl.cdiv(n, rb)

    # Shared (single) weight/bias vs per-task: choose the index_map statically
    # so a shared weight is never broadcast-materialized in HBM.
    w_map = (lambda t, r: (t, 0, 0)) if weight.shape[0] == num_tasks \
        else (lambda t, r: (0, 0, 0))
    b_map = (lambda t, r: (t, 0, 0)) if bias.shape[0] == num_tasks \
        else (lambda t, r: (0, 0, 0))

    compute_dtype = mxu_dtype if mxu_dtype is not None else weight.dtype
    kernel = functools.partial(_maml_linear_kernel, way_num=way_num,
                               mxu_dtype=mxu_dtype)

    out_padded = pl.pallas_call(
        kernel,
        out_shape=jax.ShapeDtypeStruct((num_tasks, n, way_pad), x.dtype),
        grid=(num_tasks, num_row_blocks),
        in_specs=[
            pl.BlockSpec((1, rb, feat_dim), lambda t, r: (t, r, 0)),
            pl.BlockSpec((1, way_num, feat_dim), w_map),
            pl.BlockSpec((1, 1, way_num), b_map),
        ],
        out_specs=pl.BlockSpec((1, rb, way_pad), lambda t, r: (t, r, 0)),
        scratch_shapes=[
            pltpu.VMEM((way_pad, feat_dim), compute_dtype),
            pltpu.VMEM((1, way_pad), jnp.float32),
        ],
        compiler_params=pltpu.CompilerParams(
            # Both axes are independent: tasks shard across TCs on v7x.
            dimension_semantics=("parallel", "parallel"),
            # Explicit, generation-safe VMEM budget (<= scoped default on v7x).
            vmem_limit_bytes=32 << 20,
        ),
    )(x, weight, bias3)

    out = out_padded[..., :way_num]   # drop lane padding at the pipeline edge
    if squeeze_task:
        out = out[0]
    return out


def init_maml_layer_params(key, feat_dim=64, way_num=5, dtype=jnp.float32):
    """Deterministic init mimicking nn.Linear default (uniform +/- 1/sqrt(fan_in))."""
    kw, kb = jax.random.split(key)
    bound = 1.0 / (feat_dim ** 0.5)
    weight = jax.random.uniform(kw, (way_num, feat_dim), dtype,
                                minval=-bound, maxval=bound)
    bias = jax.random.uniform(kb, (way_num,), dtype,
                              minval=-bound, maxval=bound)
    return weight, bias


if __name__ == "__main__":
    feat_dim, way_num = 64, 5
    batch = 8          # per-task query examples in the MAML inner loop
    num_tasks = 4      # tasks batched into a single gridded launch

    key = jax.random.PRNGKey(0)
    kx, kp, ktx, ktp = jax.random.split(key, 4)

    # --- single-task forward (exactly nn.Linear(feat_dim, way_num)) ---
    x = jax.random.normal(kx, (batch, feat_dim), jnp.float32)
    weight, bias = init_maml_layer_params(kp, feat_dim, way_num)
    y = jax.block_until_ready(maml_layer_forward(x, weight, bias))
    y_ref = x @ weight.T + bias
    assert y.shape == (batch, way_num)
    assert jnp.allclose(y, y_ref, atol=1e-5, rtol=1e-5)

    # --- task-batched forward (per-task fast weights, one pallas_call) ---
    xt = jax.random.normal(ktx, (num_tasks, batch, feat_dim), jnp.float32)
    wkeys = jax.random.split(ktp, num_tasks)
    wt = jnp.stack([init_maml_layer_params(k, feat_dim, way_num)[0] for k in wkeys])
    bt = jnp.stack([init_maml_layer_params(k, feat_dim, way_num)[1] for k in wkeys])
    yt = jax.block_until_ready(maml_layer_forward(xt, wt, bt))
    yt_ref = jnp.einsum("tnd,twd->tnw", xt, wt) + bt[:, None, :]
    assert yt.shape == (num_tasks, batch, way_num)
    assert jnp.allclose(yt, yt_ref, atol=1e-5, rtol=1e-5)

    # TODO(synk): the full MAML inner-loop SGD update (multiple adaptation
    # steps with gradient computation) is left to the autodiff/outer JAX code;
    # this kernel fuses the per-task forward passes only.
    print("KERNEL_OK")
</pallas_src>

<mosaic_0001>
module attributes {stable_mosaic.version = 11 : i64} {
  func.func @_maml_linear_kernel(%arg0: i32, %arg1: i32, %arg2: memref<1x8x64xf32, #tpu.memory_space<vmem>>, %arg3: memref<1x5x64xf32, #tpu.memory_space<vmem>>, %arg4: memref<1x1x5xf32, #tpu.memory_space<vmem>>, %arg5: memref<1x8x128xf32, #tpu.memory_space<vmem>>, %arg6: memref<128x64xf32, #tpu.memory_space<vmem>>, %arg7: memref<1x128xf32, #tpu.memory_space<vmem>>) attributes {dimension_semantics = [#tpu.dimension_semantics<parallel>, #tpu.dimension_semantics<parallel>], iteration_bounds = array<i64: 1, 1>, scalar_prefetch = 0 : i64, scratch_operands = 2 : i64, tpu.core_type = #tpu.core_type<tc>, window_params = [{transform_indices = @transform_0, window_bounds = array<i64: 1, 8, 64>}, {transform_indices = @transform_1, window_bounds = array<i64: 1, 5, 64>}, {transform_indices = @transform_2, window_bounds = array<i64: 1, 1, 5>}, {transform_indices = @transform_3, window_bounds = array<i64: 1, 8, 128>}]} {
    %cst = arith.constant 0.000000e+00 : f32
    %0 = vector.broadcast %cst : f32 to vector<128x64xf32>
    %c0 = arith.constant 0 : index
    %c0_0 = arith.constant 0 : index
    %1 = vector.load %arg6[%c0, %c0_0] : memref<128x64xf32, #tpu.memory_space<vmem>>, vector<128x64xf32>
    tpu.vector_store %arg6[%c0, %c0_0], %0 {strides = array<i32>} : memref<128x64xf32, #tpu.memory_space<vmem>>, vector<128x64xf32>,
    %c0_1 = arith.constant 0 : index
    %c0_2 = arith.constant 0 : index
    %c0_3 = arith.constant 0 : index
    %2 = vector.load %arg3[%c0_1, %c0_2, %c0_3] : memref<1x5x64xf32, #tpu.memory_space<vmem>>, vector<1x5x64xf32>
    %3 = vector.shape_cast %2 : vector<1x5x64xf32> to vector<5x64xf32>
    %c0_4 = arith.constant 0 : index
    %c0_5 = arith.constant 0 : index
    %4 = vector.load %arg6[%c0_4, %c0_5] : memref<128x64xf32, #tpu.memory_space<vmem>>, vector<5x64xf32>
    tpu.vector_store %arg6[%c0_4, %c0_5], %3 {strides = array<i32>} : memref<128x64xf32, #tpu.memory_space<vmem>>, vector<5x64xf32>,
    %cst_6 = arith.constant 0.000000e+00 : f32
    %5 = vector.broadcast %cst_6 : f32 to vector<1x128xf32>
    %c0_7 = arith.constant 0 : index
    %c0_8 = arith.constant 0 : index
    %6 = vector.load %arg7[%c0_7, %c0_8] : memref<1x128xf32, #tpu.memory_space<vmem>>, vector<1x128xf32>
    tpu.vector_store %arg7[%c0_7, %c0_8], %5 {strides = array<i32>} : memref<1x128xf32, #tpu.memory_space<vmem>>, vector<1x128xf32>,
    %c0_9 = arith.constant 0 : index
    %c0_10 = arith.constant 0 : index
    %c0_11 = arith.constant 0 : index
    %7 = vector.load %arg4[%c0_9, %c0_10, %c0_11] : memref<1x1x5xf32, #tpu.memory_space<vmem>>, vector<1x1x5xf32>
    %8 = vector.shape_cast %7 : vector<1x1x5xf32> to vector<1x5xf32>
    %c0_12 = arith.constant 0 : index
    %c0_13 = arith.constant 0 : index
    %9 = vector.load %arg7[%c0_12, %c0_13] : memref<1x128xf32, #tpu.memory_space<vmem>>, vector<1x5xf32>
    tpu.vector_store %arg7[%c0_12, %c0_13], %8 {strides = array<i32>} : memref<1x128xf32, #tpu.memory_space<vmem>>, vector<1x5xf32>,
    %c0_14 = arith.constant 0 : index
    %c0_15 = arith.constant 0 : index
    %c0_16 = arith.constant 0 : index
    %10 = vector.load %arg2[%c0_14, %c0_15, %c0_16] : memref<1x8x64xf32, #tpu.memory_space<vmem>>, vector<1x8x64xf32>
    %11 = vector.shape_cast %10 : vector<1x8x64xf32> to vector<8x64xf32>
    %c0_17 = arith.constant 0 : index
    %c0_18 = arith.constant 0 : index
    %12 = vector.load %arg6[%c0_17, %c0_18] : memref<128x64xf32, #tpu.memory_space<vmem>>, vector<128x64xf32>
    %cst_19 = arith.constant dense<0.000000e+00> : vector<8x128xf32>
    %13 = tpu.matmul %11, %12, %cst_19 {dimension_numbers = #tpu.dot_dimension_numbers<[1], [1], [0], [0], [0, 0, 1, 0], [], []>} : vector<8x64xf32>, vector<128x64xf32>, vector<8x128xf32> -> vector<8x128xf32>
    %c0_20 = arith.constant 0 : index
    %c0_21 = arith.constant 0 : index
    %14 = vector.load %arg7[%c0_20, %c0_21] : memref<1x128xf32, #tpu.memory_space<vmem>>, vector<1x128xf32>
    %15 = vector.broadcast %14 : vector<1x128xf32> to vector<8x128xf32>
    %16 = arith.addf %13, %15 : vector<8x128xf32>
    %c0_22 = arith.constant 0 : index
    %c0_23 = arith.constant 0 : index
    %c0_24 = arith.constant 0 : index
    %17 = vector.load %arg5[%c0_22, %c0_23, %c0_24] : memref<1x8x128xf32, #tpu.memory_space<vmem>>, vector<1x8x128xf32>
    %18 = vector.shape_cast %17 : vector<1x8x128xf32> to vector<8x128xf32>
    %19 = vector.shape_cast %16 : vector<8x128xf32> to vector<1x8x128xf32>
    tpu.vector_store %arg5[%c0_22, %c0_23, %c0_24], %19 {strides = array<i32>} : memref<1x8x128xf32, #tpu.memory_space<vmem>>, vector<1x8x128xf32>,
    return
  }
  func.func @transform_0(%arg0: i32, %arg1: i32) -> (i32, i32, i32) {
    %c0_i32 = arith.constant 0 : i32
    %c0_i32_0 = arith.constant 0 : i32
    return %arg0, %arg1, %c0_i32 : i32, i32, i32
  }
  func.func @transform_1(%arg0: i32, %arg1: i32) -> (i32, i32, i32) {
    %c0_i32 = arith.constant 0 : i32
    %c0_i32_0 = arith.constant 0 : i32
    %c0_i32_1 = arith.constant 0 : i32
    return %arg0, %c0_i32, %c0_i32_0 : i32, i32, i32
  }
  func.func @transform_2(%arg0: i32, %arg1: i32) -> (i32, i32, i32) {
    %c0_i32 = arith.constant 0 : i32
    %c0_i32_0 = arith.constant 0 : i32
    %c0_i32_1 = arith.constant 0 : i32
    return %arg0, %c0_i32, %c0_i32_0 : i32, i32, i32
  }
  func.func @transform_3(%arg0: i32, %arg1: i32) -> (i32, i32, i32) {
    %c0_i32 = arith.constant 0 : i32
    %c0_i32_0 = arith.constant 0 : i32
    return %arg0, %arg1, %c0_i32 : i32, i32, i32
  }
}

</mosaic_0001>

<bundles_post_ra>
// kernel: tpu_custom_call.1
= control target key start
LH: loop header
LB: loop body
LE: loop exit
PB: predicated region body
PF: predicated region fallthrough
CT: control target
= control target key end

     0   :  { %vm15_vm0 = vcmask 523264   ;;  %vm33_vm1 = vcmask 520192   ;;  %v329_v1 = vmov 0.0|0.0   ;;  %v330_v2 = vmov 0.0   ;;  %s414_s0 = inlined_call_operand.vmem [shape: f32[1,8,64], index: 0, kind: input, shape index: {}]   ;;  %s415_s1 = inlined_call_operand.vmem [shape: f32[1,5,64], index: 1, kind: input, shape index: {}]   ;;  %s416_s2 = inlined_call_operand.vmem [shape: f32[1,1,5], index: 2, kind: input, shape index: {}]   ;;  %s417_s3 = inlined_call_operand.hbm [shape: f32[1,8,128], index: 3, kind: output, shape index: {}]  }
   0x1   :  { %v32_v0 = vld [vmem:[%s415_s1] sm:$0x1f]  ;;  %269 = vmatprep.subr.bf16.mxu0 %v329_v1  ;;  %16 = vst.msk [vmem:[#allocation2] sm:$0xff] %vm15_vm0, %v330_v2  ;;  %17 = vst.msk [vmem:[#allocation2 + $0x8] sm:$0xff] %vm15_vm0, %v330_v2  ;;  %vm37_vm2 = vcmask 32768   ;;  %vm331_vm3 = vmmov 0  }
   0x2   :  { %18 = vst.msk [vmem:[#allocation2 + $0x10] sm:$0xff] %vm15_vm0, %v330_v2  ;;  %19 = vst.msk [vmem:[#allocation2 + $0x18] sm:$0xff] %vm15_vm0, %v330_v2  ;;  %v36_v3 = vld [vmem:[%s416_s2] sm:$0x1]  ;;  %266 = vmatprep.mubr.msk.f32.mxu0 %vm331_vm3, %v330_v2 }
   0x3   :  { %20 = vst.msk [vmem:[#allocation2 + $0x20] sm:$0xff] %vm15_vm0, %v330_v2  ;;  %21 = vst.msk [vmem:[#allocation2 + $0x28] sm:$0xff] %vm15_vm0, %v330_v2 }
   0x4   :  { %22 = vst.msk [vmem:[#allocation2 + $0x30] sm:$0xff] %vm15_vm0, %v330_v2  ;;  %23 = vst.msk [vmem:[#allocation2 + $0x38] sm:$0xff] %vm15_vm0, %v330_v2 }
   0x5   :  { %24 = vst.msk [vmem:[#allocation2 + $0x40] sm:$0xff] %vm15_vm0, %v330_v2  ;;  %25 = vst.msk [vmem:[#allocation2 + $0x48] sm:$0xff] %vm15_vm0, %v330_v2 }
   0x6   :  { %26 = vst.msk [vmem:[#allocation2 + $0x50] sm:$0xff] %vm15_vm0, %v330_v2  ;;  %27 = vst.msk [vmem:[#allocation2 + $0x58] sm:$0xff] %vm15_vm0, %v330_v2 }
   0x7   :  { %28 = vst.msk [vmem:[#allocation2 + $0x60] sm:$0xff] %vm15_vm0, %v330_v2  ;;  %29 = vst.msk [vmem:[#allocation2 + $0x68] sm:$0xff] %vm15_vm0, %v330_v2 }
   0x8   :  { %30 = vst.msk [vmem:[#allocation2 + $0x70] sm:$0xff] %vm15_vm0, %v330_v2  ;;  %31 = vst.msk [vmem:[#allocation2 + $0x78] sm:$0xff] %vm15_vm0, %v330_v2 }
   0x9   :  { %35 = vst [vmem:[#allocation3] sm:$0x1] %v330_v2  ;;  %34 = vst.msk [vmem:[#allocation2] sm:$0x1f] %vm33_vm1, %v32_v0 }
   0xa   :  { %38 = vst.msk [vmem:[#allocation3] sm:$0x1] %vm37_vm2, %v36_v3 }
   0xb   :  { %8 = vsyncpa [#allocation5], 0  ;;  %v41_v4 = vld [vmem:[#allocation2 + $0x8] sm:$0xff]  ;;  %v42_v8 = vld [vmem:[#allocation2 + $0x10] sm:$0xff]  ;;  %s332_s16 = smov [#allocation4]  }
   0xc   :  { %vm378_vm4 = vmpackc.low %vm15_vm0, %vm15_vm0  ;;  %v43_v9 = vld [vmem:[#allocation2 + $0x18] sm:$0xff]  ;;  %v44_v11 = vld [vmem:[#allocation2 + $0x20] sm:$0xff]  ;;  %s191_s17 = sshll.u32 %s332_s16, 4  ;;  %s192_s17 = int_to_ptr.vmem [resolvable:$true] %s191_s17 }
   0xd   :  { %v274_v10 = vpack.c.bf16 %v43_v9, %v42_v8  ;;  %v45_v12 = vld [vmem:[#allocation2 + $0x28] sm:$0xff]  ;;  %v46_v14 = vld [vmem:[#allocation2 + $0x30] sm:$0xff]  ;;  %v47_v15 = vld [vmem:[#allocation2 + $0x38] sm:$0xff]  ;;  %s305_s18 = scalar_lea.vmem %s192_s17, 128  ;;  %p310_p1 = scmp.lt.s32.totalorder %s192_s17, %s192_s17 }
   0xe   :  { %v278_v13 = vpack.c.bf16 %v45_v12, %v44_v11  ;;  %v282_v16 = vpack.c.bf16 %v47_v15, %v46_v14  ;;  %v48_v17 = vld [vmem:[#allocation2 + $0x40] sm:$0xff]  ;;  %v49_v18 = vld [vmem:[#allocation2 + $0x48] sm:$0xff]  ;;  %v50_v20 = vld [vmem:[#allocation2 + $0x50] sm:$0xff]  ;;  %p306_p0 = scmp.ne.s32.totalorder %s192_s17, %s305_s18  ;;  %p311_p2 = scmp.lt.s32.totalorder %s305_s18, %s305_s18 }
   0xf   :  { %v286_v19 = vpack.c.bf16 %v49_v18, %v48_v17  ;;  %v51_v21 = vld [vmem:[#allocation2 + $0x58] sm:$0xff]  ;;  %v52_v23 = vld [vmem:[#allocation2 + $0x60] sm:$0xff]  ;;  %v53_v24 = vld [vmem:[#allocation2 + $0x68] sm:$0xff] }
  0x10   :  { %v40_v5 = vld [vmem:[#allocation2] sm:$0xff]  ;;  %v290_v22 = vpack.c.bf16 %v51_v21, %v50_v20  ;;  %v294_v25 = vpack.c.bf16 %v53_v24, %v52_v23  ;;  %v54_v26 = vld [vmem:[#allocation2 + $0x70] sm:$0xff]  ;;  %v55_v27 = vld [vmem:[#allocation2 + $0x78] sm:$0xff]  ;;  %p312_p3 = por %p311_p2, %p310_p1 }
  0x11   :  { %v270_v7 = vpack.c.bf16 %v41_v4, %v40_v5  ;;  %v298_v28 = vpack.c.bf16 %v55_v27, %v54_v26  ;;  %v39_v29 = vld [vmem:[%s414_s0] sm:$0xff] }
  0x12   :  { %v199_v30 = vld [vmem:[#allocation3] ss:$0 sm:$0xff]  ;;  %p313_p4 = pnand %p312_p3, %p306_p0 }
  0x13   :  { %272 = vmatpush3.bf16.xpose.msk.msra.mxu0 %vm378_vm4, %v270_v7 }
  0x14   :  { %273 = vmatprep.subr.bf16.mxu0 %v329_v1 }
  0x1b   :  { %276 = vmatpush3.bf16.xpose.msk.msra.mxu0 %vm378_vm4, %v274_v10 }
  0x1c   :  { %277 = vmatprep.subr.bf16.mxu0 %v329_v1 }
  0x23   :  { %280 = vmatpush3.bf16.xpose.msk.msra.mxu0 %vm378_vm4, %v278_v13 }
  0x24   :  { %281 = vmatprep.subr.bf16.mxu0 %v329_v1 }
  0x2b   :  { %284 = vmatpush3.bf16.xpose.msk.msra.mxu0 %vm378_vm4, %v282_v16 }
  0x2c   :  { %285 = vmatprep.subr.bf16.mxu0 %v329_v1 }
  0x33   :  { %288 = vmatpush3.bf16.xpose.msk.msra.mxu0 %vm378_vm4, %v286_v19 }
  0x34   :  { %289 = vmatprep.subr.bf16.mxu0 %v329_v1 }
  0x3b   :  { %292 = vmatpush3.bf16.xpose.msk.msra.mxu0 %vm378_vm4, %v290_v22 }
  0x3c   :  { %293 = vmatprep.subr.bf16.mxu0 %v329_v1 }
  0x43   :  { %296 = vmatpush3.bf16.xpose.msk.msra.mxu0 %vm378_vm4, %v294_v25 }
  0x44   :  { %297 = vmatprep.subr.bf16.mxu0 %v329_v1 }
  0x4b   :  { %300 = vmatpush3.bf16.xpose.msk.msra.mxu0 %vm378_vm4, %v298_v28 }
  0x52   :  { %267 = vmatmul.mubr.msk.f32.vlgmr.msra.gmra.mrb[0].mxu0 %vm15_vm0, %v39_v29 }
 0x125   :  { %v180_v31 = vpop.f32.mrb[0].mxu0 }
 0x126   :  { %v181_v32 = vadd.f32 %v199_v30, %v180_v31  ;;  %v268_v33 = vpop.f32.mrb[1].mxu0 }
 0x128   :  { %184 = vst [vmem:[#allocation4] sm:$0xff] %v181_v32 }
 0x129   :  { %316 = shalt.err (!%p313_p4)
}
 0x12a   :  { %s317_s0 = scalar_lea.hbm %s417_s3, 128 }
 0x12b   :  { %p318_p5 = scmp.ne.s32.totalorder %s417_s3, %s317_s0  ;;  %p321_p6 = scmp.lt.u32.totalorder %s317_s0, %s417_s3 }
 0x12d   :  { %p323_p7 = pnand %p321_p6, %p318_p5 }
 0x12f   :  { %326 = shalt.err (!%p323_p7)
}
 0x130   :  { %194 = dma.vmem_to_hbm [thread:$0]  %s192_s17, 128, %s417_s3, [#allocation5]  }
 0x131   :  { %327 = dma.done.wait [#allocation5], 128  }
 0x132   :  { %328 = vsyncadd [#allocation5], 4294967168 }
 0x133   :  { %198 = vsyncpa [#allocation5], 1 }

</bundles_post_ra>
